<compile_context>
chip_gen: v7x
topology: tpu7x:2x2x1
jax: 0.10.0
libtpu: 0.0.40
codegen_flags: <defaults>
</compile_context>

<pallas_src>
import functools

import jax
import jax.numpy as jnp
from jax.experimental import pallas as pl
from jax.experimental.pallas import tpu as pltpu


def _round_up(x, m):
    return (x + m - 1) // m * m


def _pick_tile_hw(c, hw, target_bytes=4 * 1024 * 1024):
    """Lane-dense spatial tile (multiple of 128) targeting ~target_bytes of x
    per block; never larger than the (lane-rounded) spatial extent."""
    per_lane_bytes = 4 * c
    tile = (target_bytes // per_lane_bytes) // 128 * 128
    tile = max(tile, 128)
    return min(tile, _round_up(hw, 128))


# --------------------------------------------------------------------------
# Kernels
# --------------------------------------------------------------------------
def _fused_kernel(x_ref, w1t_ref, b1_ref, w2t_ref, b2_ref, o_ref, *, inv_hw):
    """One image slab resident in VMEM: pool + MLP + sigmoid + scale."""
    x = x_ref[...]                                                 # (1, C, HW)
    pooled = jnp.sum(x, axis=-1) * inv_hw                          # (1, C)
    h = jnp.dot(pooled, w1t_ref[...],
                preferred_element_type=jnp.float32) + b1_ref[...]  # (1, Cr)
    h = jnp.maximum(h, 0.0)
    s = jnp.dot(h, w2t_ref[...],
                preferred_element_type=jnp.float32) + b2_ref[...]  # (1, C)
    gate = jax.nn.sigmoid(s)                                       # (1, C)
    o_ref[...] = x * gate[:, :, None]


def _pool_sum_kernel(x_ref, sum_ref, *, tile_hw, hw, ragged):
    """Accumulate per-(n, c) spatial sums; (1, C, 1) block is resident across
    the HW ("arbitrary") grid axis.  Ragged last tile is lane-masked."""
    t = pl.program_id(1)

    @pl.when(t == 0)
    def _():
        sum_ref[...] = jnp.zeros_like(sum_ref)

    if ragged:
        last = pl.num_programs(1) - 1

        @pl.when(t != last)
        def _():
            sum_ref[...] += jnp.sum(x_ref[...], axis=-1, keepdims=True)

        @pl.when(t == last)
        def _():
            lane = jax.lax.broadcasted_iota(jnp.int32, x_ref.shape, 2)
            xs = jnp.where(t * tile_hw + lane < hw, x_ref[...], 0.0)
            sum_ref[...] += jnp.sum(xs, axis=-1, keepdims=True)
    else:
        sum_ref[...] += jnp.sum(x_ref[...], axis=-1, keepdims=True)


def _scale_kernel(x_ref, gate_ref, o_ref):
    # x_ref / o_ref: (1, C, TILE_HW); gate_ref: (1, C, 1) — broadcast over lanes.
    o_ref[...] = x_ref[...] * gate_ref[...]


# --------------------------------------------------------------------------
# Wrapper
# --------------------------------------------------------------------------
_FUSED_SLAB_LIMIT = 6 * 1024 * 1024  # bytes of one f32 (C, HW) image slab


@functools.partial(jax.jit, static_argnames=("fused_slab_limit", "tile_override"))
def channel_attention(x_nchw, w1, b1, w2, b2, *,
                      fused_slab_limit=_FUSED_SLAB_LIMIT, tile_override=None):
    """x_nchw: (N, C, H, W) f32; w1: (Cr, C); b1: (Cr,); w2: (C, Cr); b2: (C,)."""
    N, C, H, W = x_nchw.shape
    Cr = w1.shape[0]
    HW = H * W

    x3 = x_nchw.reshape(N, C, HW).astype(jnp.float32)
    slab_bytes = C * HW * 4

    # ---------------- Fused single pass: 2x-of-x HBM traffic ----------------
    if slab_bytes <= fused_slab_limit:
        w1t = jnp.asarray(w1, jnp.float32).T            # (C, Cr)
        w2t = jnp.asarray(w2, jnp.float32).T            # (Cr, C)
        b1r = jnp.asarray(b1, jnp.float32).reshape(1, Cr)
        b2r = jnp.asarray(b2, jnp.float32).reshape(1, C)

        def full2d(shape):
            return pl.BlockSpec(shape, lambda n: (0, 0))

        slab_spec = pl.BlockSpec((1, C, HW), lambda n: (n, 0, 0))

        y3 = pl.pallas_call(
            functools.partial(_fused_kernel, inv_hw=1.0 / HW),
            out_shape=jax.ShapeDtypeStruct((N, C, HW), jnp.float32),
            grid=(N,),
            in_specs=[slab_spec,
                      full2d((C, Cr)), full2d((1, Cr)),
                      full2d((Cr, C)), full2d((1, C))],
            out_specs=slab_spec,
            compiler_params=pltpu.CompilerParams(
                dimension_semantics=("parallel",),
                vmem_limit_bytes=32 * 1024 * 1024),
            cost_estimate=pl.CostEstimate(
                flops=2 * N * C * HW + 4 * N * C * Cr,
                transcendentals=N * C,
                bytes_accessed=2 * N * C * HW * 4),
        )(x3, w1t, b1r, w2t, b2r)
        return y3.reshape(N, C, H, W)

    # --------------------------- Two-pass fallback ---------------------------
    tile_hw = tile_override if tile_override is not None else _pick_tile_hw(C, HW)
    n_hw_tiles = pl.cdiv(HW, tile_hw)
    ragged = (HW % tile_hw) != 0
    block_bytes = C * tile_hw * 4
    vmem_limit = max(32 * 1024 * 1024, 4 * block_bytes + 2 * 1024 * 1024)

    x_spec = pl.BlockSpec((1, C, tile_hw), lambda n, t: (n, 0, t))
    col_spec = pl.BlockSpec((1, C, 1), lambda n, t: (n, 0, 0))

    # Pass 1: raw per-(n, c) spatial sums (MLP + sigmoid hoisted out).
    sums = pl.pallas_call(
        functools.partial(_pool_sum_kernel, tile_hw=tile_hw, hw=HW, ragged=ragged),
        out_shape=jax.ShapeDtypeStruct((N, C, 1), jnp.float32),
        grid=(N, n_hw_tiles),
        in_specs=[x_spec],
        out_specs=col_spec,
        compiler_params=pltpu.CompilerParams(
            dimension_semantics=("parallel", "arbitrary"),
            vmem_limit_bytes=vmem_limit),
        cost_estimate=pl.CostEstimate(
            flops=N * C * HW, transcendentals=0,
            bytes_accessed=N * C * HW * 4 + N * C * 4),
    )(x3)

    # Tiny MLP + sigmoid over the whole batch: one negligible XLA op.
    pooled = sums[:, :, 0] * (1.0 / HW)                                   # (N, C)
    hidden = jnp.maximum(
        pooled @ jnp.asarray(w1, jnp.float32).T + jnp.asarray(b1, jnp.float32), 0.0)
    gate = jax.nn.sigmoid(
        hidden @ jnp.asarray(w2, jnp.float32).T + jnp.asarray(b2, jnp.float32))
    gate3 = gate[:, :, None]                                              # (N, C, 1)

    # Pass 2: y = x * gate — lane-dense load-multiply-store, fully parallel.
    y3 = pl.pallas_call(
        _scale_kernel,
        out_shape=jax.ShapeDtypeStruct((N, C, HW), jnp.float32),
        grid=(N, n_hw_tiles),
        in_specs=[x_spec, col_spec],
        out_specs=x_spec,
        compiler_params=pltpu.CompilerParams(
            dimension_semantics=("parallel", "parallel"),
            vmem_limit_bytes=vmem_limit),
        cost_estimate=pl.CostEstimate(
            flops=N * C * HW, transcendentals=0,
            bytes_accessed=2 * N * C * HW * 4 + N * C * 4),
    )(x3, gate3)

    return y3.reshape(N, C, H, W)


def channel_attention_ref(x, w1, b1, w2, b2):
    """Pure-JAX reference mirroring the PyTorch module."""
    pooled = jnp.mean(x, axis=(2, 3))                       # (N, C)
    h = jnp.maximum(pooled @ w1.T + b1, 0.0)                # (N, Cr)
    s = jax.nn.sigmoid(h @ w2.T + b2)                       # (N, C)
    return x * s[:, :, None, None]


if __name__ == "__main__":
    # Module hyper-params: num_features=8, reduction=4 -> hidden = 2 channels.
    num_features, reduction = 8, 4
    Cr = num_features // reduction

    key = jax.random.PRNGKey(0)
    kx, k1, k2, k3, k4, kx2 = jax.random.split(key, 6)

    # Conv2d 1x1 weights squeezed to 2-D.
    w1 = 0.1 * jax.random.normal(k1, (Cr, num_features), dtype=jnp.float32)
    b1 = 0.1 * jax.random.normal(k2, (Cr,), dtype=jnp.float32)
    w2 = 0.1 * jax.random.normal(k3, (num_features, Cr), dtype=jnp.float32)
    b2 = 0.1 * jax.random.normal(k4, (num_features,), dtype=jnp.float32)

    # (a) Default: fused single-pass path (whole image slab resident in VMEM).
    x = jax.random.normal(kx, (2, num_features, 16, 16), dtype=jnp.float32)
    y = jax.block_until_ready(channel_attention(x, w1, b1, w2, b2))
    y_ref = channel_attention_ref(x, w1, b1, w2, b2)
    assert y.shape == x.shape
    assert jnp.allclose(y, y_ref, atol=1e-5, rtol=1e-5), float(
        jnp.max(jnp.abs(y - y_ref)))

    # (b) Two-pass path (forced), HW a multiple of the tile (accumulator path).
    y = jax.block_until_ready(
        channel_attention(x, w1, b1, w2, b2, fused_slab_limit=0, tile_override=128))
    assert jnp.allclose(y, y_ref, atol=1e-5, rtol=1e-5), float(
        jnp.max(jnp.abs(y - y_ref)))

    # (c) Two-pass path with a ragged last tile (no jnp.pad / slice anywhere).
    x2 = jax.random.normal(kx2, (2, num_features, 9, 30), dtype=jnp.float32)
    y2 = jax.block_until_ready(
        channel_attention(x2, w1, b1, w2, b2, fused_slab_limit=0, tile_override=128))
    y2_ref = channel_attention_ref(x2, w1, b1, w2, b2)
    assert y2.shape == x2.shape
    assert jnp.allclose(y2, y2_ref, atol=1e-5, rtol=1e-5), float(
        jnp.max(jnp.abs(y2 - y2_ref)))

    print("KERNEL_OK")
</pallas_src>

<mosaic_0001>
module attributes {stable_mosaic.version = 11 : i64} {
  func.func @_fused_kernel(%arg0: i32, %arg1: memref<1x8x256xf32, #tpu.memory_space<vmem>>, %arg2: memref<8x2xf32, #tpu.memory_space<vmem>>, %arg3: memref<1x2xf32, #tpu.memory_space<vmem>>, %arg4: memref<2x8xf32, #tpu.memory_space<vmem>>, %arg5: memref<1x8xf32, #tpu.memory_space<vmem>>, %arg6: memref<1x8x256xf32, #tpu.memory_space<vmem>>) attributes {dimension_semantics = [#tpu.dimension_semantics<parallel>], iteration_bounds = array<i64: 2>, scalar_prefetch = 0 : i64, scratch_operands = 0 : i64, tpu.core_type = #tpu.core_type<tc>, window_params = [{transform_indices = @transform_0, window_bounds = array<i64: 1, 8, 256>}, {pipeline_mode = #tpu.pipeline_mode<synchronous>, transform_indices = @transform_1, window_bounds = array<i64: 8, 2>}, {pipeline_mode = #tpu.pipeline_mode<synchronous>, transform_indices = @transform_2, window_bounds = array<i64: 1, 2>}, {pipeline_mode = #tpu.pipeline_mode<synchronous>, transform_indices = @transform_3, window_bounds = array<i64: 2, 8>}, {pipeline_mode = #tpu.pipeline_mode<synchronous>, transform_indices = @transform_4, window_bounds = array<i64: 1, 8>}, {transform_indices = @transform_5, window_bounds = array<i64: 1, 8, 256>}]} {
    %c0 = arith.constant 0 : index
    %c0_0 = arith.constant 0 : index
    %c0_1 = arith.constant 0 : index
    %0 = vector.load %arg1[%c0, %c0_0, %c0_1] : memref<1x8x256xf32, #tpu.memory_space<vmem>>, vector<1x8x256xf32>
    %cst = arith.constant dense<0.000000e+00> : vector<1x8xf32>
    %1 = vector.multi_reduction <add>, %0, %cst [2] : vector<1x8x256xf32> to vector<1x8xf32>
    %cst_2 = arith.constant 3.906250e-03 : f32
    %2 = vector.broadcast %cst_2 : f32 to vector<1x8xf32>
    %3 = arith.mulf %1, %2 : vector<1x8xf32>
    %c0_3 = arith.constant 0 : index
    %c0_4 = arith.constant 0 : index
    %4 = vector.load %arg2[%c0_3, %c0_4] : memref<8x2xf32, #tpu.memory_space<vmem>>, vector<8x2xf32>
    %cst_5 = arith.constant dense<0.000000e+00> : vector<1x2xf32>
    %5 = tpu.matmul %3, %4, %cst_5 {dimension_numbers = #tpu.dot_dimension_numbers<[1], [0], [0], [1], [0, 0, 1, 1], [], []>} : vector<1x8xf32>, vector<8x2xf32>, vector<1x2xf32> -> vector<1x2xf32>
    %c0_6 = arith.constant 0 : index
    %c0_7 = arith.constant 0 : index
    %6 = vector.load %arg3[%c0_6, %c0_7] : memref<1x2xf32, #tpu.memory_space<vmem>>, vector<1x2xf32>
    %7 = arith.addf %5, %6 : vector<1x2xf32>
    %cst_8 = arith.constant 0.000000e+00 : f32
    %8 = vector.broadcast %cst_8 : f32 to vector<1x2xf32>
    %9 = arith.maximumf %7, %8 : vector<1x2xf32>
    %c0_9 = arith.constant 0 : index
    %c0_10 = arith.constant 0 : index
    %10 = vector.load %arg4[%c0_9, %c0_10] : memref<2x8xf32, #tpu.memory_space<vmem>>, vector<2x8xf32>
    %cst_11 = arith.constant dense<0.000000e+00> : vector<1x8xf32>
    %11 = tpu.matmul %9, %10, %cst_11 {dimension_numbers = #tpu.dot_dimension_numbers<[1], [0], [0], [1], [0, 0, 1, 1], [], []>} : vector<1x2xf32>, vector<2x8xf32>, vector<1x8xf32> -> vector<1x8xf32>
    %c0_12 = arith.constant 0 : index
    %c0_13 = arith.constant 0 : index
    %12 = vector.load %arg5[%c0_12, %c0_13] : memref<1x8xf32, #tpu.memory_space<vmem>>, vector<1x8xf32>
    %13 = arith.addf %11, %12 : vector<1x8xf32>
    %14 = arith.negf %13 : vector<1x8xf32>
    %15 = math.exp %14 : vector<1x8xf32>
    %cst_14 = arith.constant 1.000000e+00 : f32
    %16 = vector.broadcast %cst_14 : f32 to vector<1x8xf32>
    %17 = arith.addf %16, %15 : vector<1x8xf32>
    %18 = arith.divf %16, %17 : vector<1x8xf32>
    %19 = vector.shape_cast %18 : vector<1x8xf32> to vector<1x8x1xf32>
    %20 = vector.broadcast %19 : vector<1x8x1xf32> to vector<1x8x256xf32>
    %21 = arith.mulf %0, %20 : vector<1x8x256xf32>
    %c0_15 = arith.constant 0 : index
    %c0_16 = arith.constant 0 : index
    %c0_17 = arith.constant 0 : index
    %22 = vector.load %arg6[%c0_15, %c0_16, %c0_17] : memref<1x8x256xf32, #tpu.memory_space<vmem>>, vector<1x8x256xf32>
    tpu.vector_store %arg6[%c0_15, %c0_16, %c0_17], %21 {strides = array<i32>} : memref<1x8x256xf32, #tpu.memory_space<vmem>>, vector<1x8x256xf32>,
    return
  }
  func.func @transform_0(%arg0: i32) -> (i32, i32, i32) {
    %c0_i32 = arith.constant 0 : i32
    %c0_i32_0 = arith.constant 0 : i32
    %c0_i32_1 = arith.constant 0 : i32
    return %arg0, %c0_i32, %c0_i32_0 : i32, i32, i32
  }
  func.func @transform_1(%arg0: i32) -> (i32, i32) {
    %c0_i32 = arith.constant 0 : i32
    %c0_i32_0 = arith.constant 0 : i32
    %c0_i32_1 = arith.constant 0 : i32
    return %c0_i32, %c0_i32_0 : i32, i32
  }
  func.func @transform_2(%arg0: i32) -> (i32, i32) {
    %c0_i32 = arith.constant 0 : i32
    %c0_i32_0 = arith.constant 0 : i32
    %c0_i32_1 = arith.constant 0 : i32
    return %c0_i32, %c0_i32_0 : i32, i32
  }
  func.func @transform_3(%arg0: i32) -> (i32, i32) {
    %c0_i32 = arith.constant 0 : i32
    %c0_i32_0 = arith.constant 0 : i32
    %c0_i32_1 = arith.constant 0 : i32
    return %c0_i32, %c0_i32_0 : i32, i32
  }
  func.func @transform_4(%arg0: i32) -> (i32, i32) {
    %c0_i32 = arith.constant 0 : i32
    %c0_i32_0 = arith.constant 0 : i32
    %c0_i32_1 = arith.constant 0 : i32
    return %c0_i32, %c0_i32_0 : i32, i32
  }
  func.func @transform_5(%arg0: i32) -> (i32, i32, i32) {
    %c0_i32 = arith.constant 0 : i32
    %c0_i32_0 = arith.constant 0 : i32
    %c0_i32_1 = arith.constant 0 : i32
    return %arg0, %c0_i32, %c0_i32_0 : i32, i32, i32
  }
}

</mosaic_0001>

<bundles_post_ra>
// kernel: channel_attention.1
= control target key start
LH: loop header
LB: loop body
LE: loop exit
PB: predicated region body
PF: predicated region fallthrough
CT: control target
= control target key end

     0   :  { %s551_s18 = smov 0   ;;  %s587_s0 = inlined_call_operand.vmem [shape: f32[2,8,256], index: 0, kind: input, shape index: {}]   ;;  %s588_s1 = inlined_call_operand.vmem [shape: f32[8,2], index: 1, kind: input, shape index: {}]   ;;  %s589_s2 = inlined_call_operand.vmem [shape: f32[1,2], index: 2, kind: input, shape index: {}]   ;;  %s590_s3 = inlined_call_operand.vmem [shape: f32[2,8], index: 3, kind: input, shape index: {}]   ;;  %s591_s4 = inlined_call_operand.vmem [shape: f32[1,8], index: 4, kind: input, shape index: {}]   ;;  %s592_s5 = inlined_call_operand.vmem [shape: f32[2,8,256], index: 5, kind: output, shape index: {}]  }
   0x1 LB: > { %s466_s19 = sadd.s32 4294967295, %s517_s18   ;;  %p470_p0 = scmp.ge.s32.totalorder %s517_s18, 1  ;;  %s517_s18 = sphi %s551_s18, %s15_s18  }
   0x2   : > { %p187_p1 = scmp.lt.s32.totalorder %s517_s18, 3 }
   0x4   : > { %p188_p2 = pnand %p470_p0, %p187_p1 }
   0x5   : > { %p215_p3 = scmp.lt.s32.totalorder (!%p188_p2), %s466_s19, 1  ;;  %v519_v3 = vmov (!%p188_p2), 0.0   ;;  %v231_v4 = vld [vmem:[%s588_s1] sm:$0xff] (!%p188_p2)  ;;  %vm520_vm0 = vmmov (!%p188_p2), 0   ;;  %v234_v5 = vlaneseq (!%p188_p2)  ;;  %vm240_vm1 = vcmask (!%p188_p2), 64512  }
   0x6   : > { %191 = sbr.rel (%p188_p2) target bundleno = 741 (0x2e5), region = 40  ;;  %487 = vmatprep.subr.mxu0 (!%p188_p2), %v519_v3  ;;  %492 = vmatprep.subr.mxu1 (!%p188_p2), %v519_v3  ;;  %v314_v12 = vld [vmem:[%s590_s3] sm:$0x3] (!%p188_p2)  ;;  %vm320_vm2 = vcmask (!%p188_p2), 1041408   ;;  %vm316_vm3 = vcmask (!%p188_p2), 15360  }
   0x7   : > { %488 = vmatpush3.msra.mxu0 (!%p188_p2), %v231_v4  ;;  %489 = vmatprep.mubr.msk.f32.mxu0 (!%p188_p2), %vm520_vm0, %v519_v3  ;;  %v235_v6 = vand.u32 (!%p188_p2), 127, %v234_v5  ;;  %v237_v7 = vshrl.u32 (!%p188_p2), %v234_v5, 7  ;;  %v232_v13 = vld [vmem:[%s589_s2] sm:$0x1] (!%p188_p2) }
   0x8   : > { %494 = vmatprep.mubr.msk.f32.mxu1 (!%p188_p2), %vm520_vm0, %v519_v3  ;;  %493 = vmatpush3.msk.msra.mxu1 (!%p188_p2), %vm320_vm2, %v314_v12  ;;  %v315_v18 = vld [vmem:[%s591_s4] sm:$0x1] (!%p188_p2) }
   0x9   : > { %v238_v8 = vsub.s32 (!%p188_p2), %v235_v6, %v237_v7  ;;  %v402_v25 = vsub.s32 (!%p188_p2), 0, %v237_v7 }
   0xd   : > { %s594_s19 = smov (!%p215_p3, %s466_s19), 1 }
   0xe   : > { %s481_s20 = sshll.u32 %s594_s19, 4 }
   0xf   : > { %s219_s23 = scalar_lea.vmem %s587_s0, %s481_s20  ;;  %s224_s9 = scalar_lea.vmem %s592_s5, %s481_s20 }
  0x10   : > { %v225_v0 = vld [vmem:[%s219_s23] sm:$0xff]  ;;  %v226_v1 = vld [vmem:[%s219_s23 + $0x8] sm:$0xff] }
  0x11   : > { %v227_v2 = vadd.f32 %v226_v1, %v225_v0 }
  0x13   : > { %228 = vadd.xlane.f32.xlu0 %v227_v2 }
  0xa0   : > { %v229_v9 = vpop.xlane.xlu0 %228 }
  0xa1   : > { %v230_v10 = vmul.f32 0.00390625, %v229_v9 }
  0xa3   : > { %v239_v11 = vrot.slane %v230_v10, %v238_v8 }
  0xa5   : > { %490 = vmatmul.mubr.msk.f32.vlgmr.msra.gmra.mrb[0].mxu0 %vm240_vm1, %v239_v11 }
 0x178   : > { %v309_v14 = vpop.f32.mrb[0].mxu0 }
 0x179   : > { %v310_v15 = vadd.f32 %v309_v14, %v232_v13  ;;  %v491_v16 = vpop.f32.mrb[1].mxu0 }
 0x17b   : > { %v313_v17 = vmax.f32 %v310_v15, 0.0 }
 0x17d   : > { %495 = vmatmul.mubr.msk.f32.vlgmr.msra.gmra.mrb[0].mxu1 %vm316_vm3, %v313_v17 }
 0x250   : > { %v390_v19 = vpop.f32.mrb[0].mxu1 }
 0x251   : > { %v391_v20 = vadd.f32 %v390_v19, %v315_v18  ;;  %v496_v21 = vpop.f32.mrb[1].mxu1 }
 0x253   : > { %v478_v22 = vmul.f32 -1.442695, %v391_v20 }
 0x255   : > { %507 = vpow2.f32 %v478_v22 }
 0x25f   : > { %v508_v23 = vpop.eup %507 }
 0x260   : > { %v397_v24 = vadd.f32 1.0, %v508_v23 }
 0x262   : > { %509 = vrcp.f32 %v397_v24 }
 0x26c   : > { %v510_v26 = vpop.eup %509 }
 0x26d   : > { %v403_v27 = vrot.slane %v510_v26, %v402_v25 }
 0x26f   : > { %405 = vbcast.lane.b32.xlu0 %v403_v27, 256 }
 0x2e1   : > { %v406_v28 = vpop.permute.xlu0 %405 }
 0x2e2   : > { %v407_v29 = vmul.f32 %v406_v28, %v225_v0  ;;  %v408_v30 = vmul.f32 %v406_v28, %v226_v1 }
 0x2e4   : > { %409 = vst [vmem:[%s224_s9] sm:$0xff] %v407_v29  ;;  %410 = vst [vmem:[%s224_s9 + $0x8] sm:$0xff] %v408_v30 }
 0x2e5 PF: > { %s15_s18 = sadd.s32 1, %s517_s18  }
 0x2e6   : > { %p12_p4 = scmp.ge.s32.totalorder %s15_s18, 4  }
 0x2e8   :  { %14 = sbr.rel (!%p12_p4) target bundleno = 1 (0x1), region = 70 }

</bundles_post_ra>
